<compile_context>
chip_gen: v7x
topology: tpu7x:2x2x1
jax: 0.10.0
libtpu: 0.0.40
codegen_flags: <defaults>
</compile_context>

<pallas_src>
import functools
import math

import jax
import jax.numpy as jnp
from jax.experimental import pallas as pl
from jax.experimental.pallas import tpu as pltpu


LANE = 128     # lane width: pad all feature dims to a multiple of this
TM_CAP = 512   # max rows per grid step; keeps double-buffered x tiles small (v7x: 64 MiB VMEM)


def _round_up(n, m):
    return ((n + m - 1) // m) * m


# ---------------------------------------------------------------------------
# Fused MLP kernel: the whole Linear(+ReLU) stack runs in one kernel body.
# Weights/biases use a constant index_map so they stay resident across the
# batch grid; intermediates live in vregs/VMEM only.
# ---------------------------------------------------------------------------
def _fused_mlp_kernel(x_ref, *refs, n_layers):
    o_ref = refs[-1]
    h = x_ref[...]
    for i in range(n_layers):
        w = refs[2 * i][...]        # (Kpad_i, Npad_i)
        b = refs[2 * i + 1][...]    # (1, Npad_i) -> broadcasts over rows
        h = jnp.dot(h, w, preferred_element_type=jnp.float32) + b
        if i < n_layers - 1:
            h = jnp.maximum(h, 0.0)  # ReLU on every layer except the last
    o_ref[...] = h.astype(o_ref.dtype)


def fused_mlp(x2d, padded_params, out_features):
    """x2d: (M, K) f32, padded_params: [(w_t (Kpad, Npad), b (1, Npad)), ...]."""
    M, K = x2d.shape
    n_layers = len(padded_params)
    k_pad = padded_params[0][0].shape[0]
    n_pad_last = padded_params[-1][0].shape[1]

    # Pad the flattened feature (lane) dim to a multiple of 128.
    if K < k_pad:
        x2d = jnp.pad(x2d, ((0, 0), (0, k_pad - K)))

    # Batch tiling: single block for small M (block == full array -> exempt from
    # the sublane-of-8 rule), otherwise a parallel grid of TM_CAP-row tiles.
    if M <= TM_CAP:
        tm, m_pad = M, M
    else:
        tm = TM_CAP
        m_pad = _round_up(M, tm)
    if m_pad > M:
        x2d = jnp.pad(x2d, ((0, m_pad - M), (0, 0)))

    in_specs = [pl.BlockSpec((tm, k_pad), lambda i: (i, 0))]
    operands = [x2d]
    for (w_t, b) in padded_params:
        kp, np_ = w_t.shape
        in_specs.append(pl.BlockSpec((kp, np_), lambda i: (0, 0)))   # resident weight
        in_specs.append(pl.BlockSpec((1, np_), lambda i: (0, 0)))    # resident bias
        operands.extend([w_t, b])

    kernel = functools.partial(_fused_mlp_kernel, n_layers=n_layers)
    out = pl.pallas_call(
        kernel,
        out_shape=jax.ShapeDtypeStruct((m_pad, n_pad_last), x2d.dtype),
        grid=(m_pad // tm,),
        in_specs=in_specs,
        out_specs=pl.BlockSpec((tm, n_pad_last), lambda i: (i, 0)),
        compiler_params=pltpu.CompilerParams(
            dimension_semantics=("parallel",),
            vmem_limit_bytes=16 << 20,  # ~6.5 MiB measured footprint + headroom; safe on v5e/v6e/v7x
        ),
    )(*operands)

    return out[:M, :out_features]


# ---------------------------------------------------------------------------
# Parameter construction (mimics signed_kaiming_constant_: uniform(-std, std),
# gain('sigmoid')=1, k=1 -> std = 1/sqrt(fan_in)) and zero-padding to 128-lanes.
# ---------------------------------------------------------------------------
def init_network_params(key, layer_sizes):
    params = []
    for (fan_in, fan_out) in layer_sizes:
        key, kw, kb = jax.random.split(key, 3)
        std = 1.0 / math.sqrt(fan_in)
        # PyTorch stores weight as (out, in); pre-transpose to (in, out) for the kernel.
        w = jax.random.uniform(kw, (fan_out, fan_in), jnp.float32, -std, std)
        bound = 1.0 / math.sqrt(fan_in)
        b = jax.random.uniform(kb, (fan_out,), jnp.float32, -bound, bound)
        params.append((jnp.transpose(w), b))
    return params


def pad_params(params, in_features):
    """Zero-pad every (in, out) dim to a multiple of 128.  Padded output columns
    get zero weight + zero bias, so they carry exact zeros through ReLU and the
    padded input rows of the next layer contribute nothing."""
    padded = []
    k_prev_pad = _round_up(in_features, LANE)
    for (w_t, b) in params:
        k, n = w_t.shape
        n_pad = _round_up(n, LANE)
        w_p = jnp.zeros((k_prev_pad, n_pad), w_t.dtype).at[:k, :n].set(w_t)
        b_p = jnp.zeros((1, n_pad), b.dtype).at[0, :n].set(b)
        padded.append((w_p, b_p))
        k_prev_pad = n_pad
    return padded


# ---------------------------------------------------------------------------
# Forward passes
# ---------------------------------------------------------------------------
def network_forward(params, x):
    M = x.shape[0]
    h = x.reshape(M, -1)                               # nn.Flatten (NCHW -> (N, C*H*W))
    padded = pad_params(params, h.shape[1])
    out_features = params[-1][0].shape[1]
    return fused_mlp(h, padded, out_features)


def network_forward_ref(params, x):
    M = x.shape[0]
    h = x.reshape(M, -1)
    n_layers = len(params)
    for i, (w_t, b) in enumerate(params):
        h = h @ w_t + b
        if i < n_layers - 1:
            h = jnp.maximum(h, 0.0)
    return h


if __name__ == "__main__":
    key = jax.random.PRNGKey(0)
    key, kx = jax.random.split(key)

    # Small shapes consistent with the module: NCHW input, flattened dim = 4*16*16.
    batch, C, H, W = 2, 4, 16, 16
    in_features = C * H * W                      # 1024
    layer_sizes = [(in_features, 128), (128, 64), (64, 10)]

    x = jax.random.normal(kx, (batch, C, H, W), jnp.float32)
    params = init_network_params(key, layer_sizes)

    out = network_forward(params, x)
    out = jax.block_until_ready(out)

    ref = network_forward_ref(params, x)
    assert out.shape == (batch, layer_sizes[-1][1]), out.shape
    assert jnp.allclose(out, ref, atol=1e-4, rtol=1e-4)

    print("KERNEL_OK")
</pallas_src>

<mosaic_0001>
module attributes {stable_mosaic.version = 11 : i64} {
  func.func @_fused_mlp_kernel(%arg0: i32, %arg1: memref<2x1024xf32, #tpu.memory_space<vmem>>, %arg2: memref<1024x128xf32, #tpu.memory_space<vmem>>, %arg3: memref<1x128xf32, #tpu.memory_space<vmem>>, %arg4: memref<128x128xf32, #tpu.memory_space<vmem>>, %arg5: memref<1x128xf32, #tpu.memory_space<vmem>>, %arg6: memref<128x128xf32, #tpu.memory_space<vmem>>, %arg7: memref<1x128xf32, #tpu.memory_space<vmem>>, %arg8: memref<2x128xf32, #tpu.memory_space<vmem>>) attributes {dimension_semantics = [#tpu.dimension_semantics<parallel>], iteration_bounds = array<i64: 1>, scalar_prefetch = 0 : i64, scratch_operands = 0 : i64, tpu.core_type = #tpu.core_type<tc>, window_params = [{transform_indices = @transform_0, window_bounds = array<i64: 2, 1024>}, {pipeline_mode = #tpu.pipeline_mode<synchronous>, transform_indices = @transform_1, window_bounds = array<i64: 1024, 128>}, {pipeline_mode = #tpu.pipeline_mode<synchronous>, transform_indices = @transform_2, window_bounds = array<i64: 1, 128>}, {pipeline_mode = #tpu.pipeline_mode<synchronous>, transform_indices = @transform_3, window_bounds = array<i64: 128, 128>}, {pipeline_mode = #tpu.pipeline_mode<synchronous>, transform_indices = @transform_4, window_bounds = array<i64: 1, 128>}, {pipeline_mode = #tpu.pipeline_mode<synchronous>, transform_indices = @transform_5, window_bounds = array<i64: 128, 128>}, {pipeline_mode = #tpu.pipeline_mode<synchronous>, transform_indices = @transform_6, window_bounds = array<i64: 1, 128>}, {transform_indices = @transform_7, window_bounds = array<i64: 2, 128>}]} {
    %c0 = arith.constant 0 : index
    %c0_0 = arith.constant 0 : index
    %0 = vector.load %arg1[%c0, %c0_0] : memref<2x1024xf32, #tpu.memory_space<vmem>>, vector<2x1024xf32>
    %c0_1 = arith.constant 0 : index
    %c0_2 = arith.constant 0 : index
    %1 = vector.load %arg2[%c0_1, %c0_2] : memref<1024x128xf32, #tpu.memory_space<vmem>>, vector<1024x128xf32>
    %c0_3 = arith.constant 0 : index
    %c0_4 = arith.constant 0 : index
    %2 = vector.load %arg3[%c0_3, %c0_4] : memref<1x128xf32, #tpu.memory_space<vmem>>, vector<1x128xf32>
    %cst = arith.constant dense<0.000000e+00> : vector<2x128xf32>
    %3 = tpu.matmul %0, %1, %cst {dimension_numbers = #tpu.dot_dimension_numbers<[1], [0], [0], [1], [0, 0, 1, 1], [], []>} : vector<2x1024xf32>, vector<1024x128xf32>, vector<2x128xf32> -> vector<2x128xf32>
    %4 = vector.broadcast %2 : vector<1x128xf32> to vector<2x128xf32>
    %5 = arith.addf %3, %4 : vector<2x128xf32>
    %cst_5 = arith.constant 0.000000e+00 : f32
    %6 = vector.broadcast %cst_5 : f32 to vector<2x128xf32>
    %7 = arith.maximumf %5, %6 : vector<2x128xf32>
    %c0_6 = arith.constant 0 : index
    %c0_7 = arith.constant 0 : index
    %8 = vector.load %arg4[%c0_6, %c0_7] : memref<128x128xf32, #tpu.memory_space<vmem>>, vector<128x128xf32>
    %c0_8 = arith.constant 0 : index
    %c0_9 = arith.constant 0 : index
    %9 = vector.load %arg5[%c0_8, %c0_9] : memref<1x128xf32, #tpu.memory_space<vmem>>, vector<1x128xf32>
    %cst_10 = arith.constant dense<0.000000e+00> : vector<2x128xf32>
    %10 = tpu.matmul %7, %8, %cst_10 {dimension_numbers = #tpu.dot_dimension_numbers<[1], [0], [0], [1], [0, 0, 1, 1], [], []>} : vector<2x128xf32>, vector<128x128xf32>, vector<2x128xf32> -> vector<2x128xf32>
    %11 = vector.broadcast %9 : vector<1x128xf32> to vector<2x128xf32>
    %12 = arith.addf %10, %11 : vector<2x128xf32>
    %cst_11 = arith.constant 0.000000e+00 : f32
    %13 = vector.broadcast %cst_11 : f32 to vector<2x128xf32>
    %14 = arith.maximumf %12, %13 : vector<2x128xf32>
    %c0_12 = arith.constant 0 : index
    %c0_13 = arith.constant 0 : index
    %15 = vector.load %arg6[%c0_12, %c0_13] : memref<128x128xf32, #tpu.memory_space<vmem>>, vector<128x128xf32>
    %c0_14 = arith.constant 0 : index
    %c0_15 = arith.constant 0 : index
    %16 = vector.load %arg7[%c0_14, %c0_15] : memref<1x128xf32, #tpu.memory_space<vmem>>, vector<1x128xf32>
    %cst_16 = arith.constant dense<0.000000e+00> : vector<2x128xf32>
    %17 = tpu.matmul %14, %15, %cst_16 {dimension_numbers = #tpu.dot_dimension_numbers<[1], [0], [0], [1], [0, 0, 1, 1], [], []>} : vector<2x128xf32>, vector<128x128xf32>, vector<2x128xf32> -> vector<2x128xf32>
    %18 = vector.broadcast %16 : vector<1x128xf32> to vector<2x128xf32>
    %19 = arith.addf %17, %18 : vector<2x128xf32>
    %c0_17 = arith.constant 0 : index
    %c0_18 = arith.constant 0 : index
    %20 = vector.load %arg8[%c0_17, %c0_18] : memref<2x128xf32, #tpu.memory_space<vmem>>, vector<2x128xf32>
    tpu.vector_store %arg8[%c0_17, %c0_18], %19 {strides = array<i32>} : memref<2x128xf32, #tpu.memory_space<vmem>>, vector<2x128xf32>,
    return
  }
  func.func @transform_0(%arg0: i32) -> (i32, i32) {
    %c0_i32 = arith.constant 0 : i32
    %c0_i32_0 = arith.constant 0 : i32
    return %arg0, %c0_i32 : i32, i32
  }
  func.func @transform_1(%arg0: i32) -> (i32, i32) {
    %c0_i32 = arith.constant 0 : i32
    %c0_i32_0 = arith.constant 0 : i32
    %c0_i32_1 = arith.constant 0 : i32
    return %c0_i32, %c0_i32_0 : i32, i32
  }
  func.func @transform_2(%arg0: i32) -> (i32, i32) {
    %c0_i32 = arith.constant 0 : i32
    %c0_i32_0 = arith.constant 0 : i32
    %c0_i32_1 = arith.constant 0 : i32
    return %c0_i32, %c0_i32_0 : i32, i32
  }
  func.func @transform_3(%arg0: i32) -> (i32, i32) {
    %c0_i32 = arith.constant 0 : i32
    %c0_i32_0 = arith.constant 0 : i32
    %c0_i32_1 = arith.constant 0 : i32
    return %c0_i32, %c0_i32_0 : i32, i32
  }
  func.func @transform_4(%arg0: i32) -> (i32, i32) {
    %c0_i32 = arith.constant 0 : i32
    %c0_i32_0 = arith.constant 0 : i32
    %c0_i32_1 = arith.constant 0 : i32
    return %c0_i32, %c0_i32_0 : i32, i32
  }
  func.func @transform_5(%arg0: i32) -> (i32, i32) {
    %c0_i32 = arith.constant 0 : i32
    %c0_i32_0 = arith.constant 0 : i32
    %c0_i32_1 = arith.constant 0 : i32
    return %c0_i32, %c0_i32_0 : i32, i32
  }
  func.func @transform_6(%arg0: i32) -> (i32, i32) {
    %c0_i32 = arith.constant 0 : i32
    %c0_i32_0 = arith.constant 0 : i32
    %c0_i32_1 = arith.constant 0 : i32
    return %c0_i32, %c0_i32_0 : i32, i32
  }
  func.func @transform_7(%arg0: i32) -> (i32, i32) {
    %c0_i32 = arith.constant 0 : i32
    %c0_i32_0 = arith.constant 0 : i32
    return %arg0, %c0_i32 : i32, i32
  }
}

</mosaic_0001>

<bundles_post_ra>
// kernel: tpu_custom_call.1
= control target key start
LH: loop header
LB: loop body
LE: loop exit
PB: predicated region body
PF: predicated region fallthrough
CT: control target
= control target key end

     0   :  { %12 = vsyncpa [#allocation3], 0  ;;  %s1457_s0 = inlined_call_operand.hbm [shape: f32[2,1024], index: 0, kind: input, shape index: {}]   ;;  %s1458_s1 = inlined_call_operand.hbm [shape: f32[1024,128], index: 1, kind: input, shape index: {}]   ;;  %s1459_s2 = inlined_call_operand.vmem [shape: f32[1,128], index: 2, kind: input, shape index: {}]   ;;  %s1460_s3 = inlined_call_operand.hbm [shape: f32[128,128], index: 3, kind: input, shape index: {}]   ;;  %s1461_s4 = inlined_call_operand.vmem [shape: f32[1,128], index: 4, kind: input, shape index: {}]   ;;  %s1462_s5 = inlined_call_operand.hbm [shape: f32[128,128], index: 5, kind: input, shape index: {}]   ;;  %s1463_s6 = inlined_call_operand.vmem [shape: f32[1,128], index: 6, kind: input, shape index: {}]   ;;  %s1464_s7 = inlined_call_operand.hbm [shape: f32[2,128], index: 7, kind: output, shape index: {}]  }
   0x1   :  { %13 = vsyncpa [#allocation6], 0 }
   0x2   :  { %14 = vsyncpa [#allocation9], 0 }
   0x3   :  { %15 = vsyncpa [#allocation4], 0  ;;  %s1301_s24 = smov [#allocation5]   ;;  %s1183_s28 = scalar_lea.hbm %s1458_s1, 16384 }
   0x4   :  { %s31_s25 = sshll.u32 %s1301_s24, 4  ;;  %p1184_p0 = scmp.ne.s32.totalorder %s1458_s1, %s1183_s28  ;;  %s32_s25 = int_to_ptr.vmem [resolvable:$true] %s31_s25 }
   0x5   :  { %p1187_p1 = scmp.lt.u32.totalorder %s1183_s28, %s1458_s1 }
   0x7   :  { %p1189_p2 = pnand %p1187_p1, %p1184_p0 }
   0x9   :  { %1192 = shalt.err (!%p1189_p2)
}
   0xa   :  { %s1193_s10 = scalar_lea.vmem %s32_s25, 16384  ;;  %p1198_p4 = scmp.lt.s32.totalorder %s32_s25, %s32_s25 }
   0xb   :  { %p1194_p3 = scmp.ne.s32.totalorder %s32_s25, %s1193_s10  ;;  %p1199_p5 = scmp.lt.s32.totalorder %s1193_s10, %s1193_s10 }
   0xd   :  { %p1200_p6 = por %p1199_p5, %p1198_p4 }
   0xf   :  { %p1201_p7 = pnand %p1200_p6, %p1194_p3 }
  0x11   :  { %1204 = shalt.err (!%p1201_p7)
}
  0x12   :  { %s1302_s11 = smov 128   ;;  %s1303_s12 = smov 8  }
  0x13   :  { %37 = dma.hbm_to_vmem [thread:$0]  %s1458_s1, 16384, %s32_s25, [#allocation6], %s1302_s11, %s1302_s11, %s1303_s12  }
  0x14   :  { %s1304_s15 = smov [#allocation2]   ;;  %s1305_s17 = smov [#allocation7]  }
  0x15   :  { %s22_s16 = sshll.u32 %s1304_s15, 4  ;;  %s45_s18 = sshll.u32 %s1305_s17, 4  ;;  %s23_s16 = int_to_ptr.vmem [resolvable:$true] %s22_s16  ;;  %s46_s18 = int_to_ptr.vmem [resolvable:$true] %s45_s18 }
  0x16   :  { %s1205_s21 = scalar_lea.hbm %s1457_s0, 256 }
  0x17   :  { %p1206_p8 = scmp.ne.s32.totalorder %s1457_s0, %s1205_s21  ;;  %p1209_p9 = scmp.lt.u32.totalorder %s1205_s21, %s1457_s0 }
  0x19   :  { %p1211_p10 = pnand %p1209_p9, %p1206_p8 }
  0x1b   :  { %1214 = shalt.err (!%p1211_p10)
}
  0x1c   :  { %s1215_s1 = scalar_lea.vmem %s23_s16, 256  ;;  %p1220_p12 = scmp.lt.s32.totalorder %s23_s16, %s23_s16 }
  0x1d   :  { %p1216_p11 = scmp.ne.s32.totalorder %s23_s16, %s1215_s1  ;;  %p1221_p13 = scmp.lt.s32.totalorder %s1215_s1, %s1215_s1 }
  0x1f   :  { %p1222_p0 = por %p1221_p13, %p1220_p12 }
  0x21   :  { %p1223_p1 = pnand %p1222_p0, %p1216_p11 }
  0x23   :  { %1226 = shalt.err (!%p1223_p1)
}
  0x24   :  { %25 = dma.hbm_to_vmem [thread:$0]  %s1457_s0, 256, %s23_s16, [#allocation3]  }
  0x25   :  { %s1227_s30 = scalar_lea.hbm %s1460_s3, 2048 }
  0x26   :  { %p1228_p2 = scmp.ne.s32.totalorder %s1460_s3, %s1227_s30  ;;  %p1231_p3 = scmp.lt.u32.totalorder %s1227_s30, %s1460_s3 }
  0x28   :  { %p1233_p4 = pnand %p1231_p3, %p1228_p2 }
  0x2a   :  { %1236 = shalt.err (!%p1233_p4)
}
  0x2b   :  { %s1237_s14 = scalar_lea.vmem %s46_s18, 2048  ;;  %p1242_p6 = scmp.lt.s32.totalorder %s46_s18, %s46_s18 }
  0x2c   :  { %p1238_p5 = scmp.ne.s32.totalorder %s46_s18, %s1237_s14  ;;  %p1243_p7 = scmp.lt.s32.totalorder %s1237_s14, %s1237_s14 }
  0x2e   :  { %p1244_p8 = por %p1243_p7, %p1242_p6 }
  0x30   :  { %p1245_p9 = pnand %p1244_p8, %p1238_p5 }
  0x32   :  { %1248 = shalt.err (!%p1245_p9)
}
  0x33   :  { %51 = dma.hbm_to_vmem [thread:$0]  %s1460_s3, 2048, %s46_s18, [#allocation6], %s1302_s11, %s1302_s11, %s1303_s12  }
  0x34   :  { %s1306_s16 = smov [#allocation8]   ;;  %s1249_s21 = scalar_lea.hbm %s1462_s5, 2048 }
  0x35   :  { %s59_s17 = sshll.u32 %s1306_s16, 4  ;;  %p1250_p10 = scmp.ne.s32.totalorder %s1462_s5, %s1249_s21  ;;  %s60_s17 = int_to_ptr.vmem [resolvable:$true] %s59_s17 }
  0x36   :  { %p1253_p11 = scmp.lt.u32.totalorder %s1249_s21, %s1462_s5 }
  0x38   :  { %p1255_p12 = pnand %p1253_p11, %p1250_p10 }
  0x3a   :  { %1258 = shalt.err (!%p1255_p12)
}
  0x3b   :  { %s1259_s1 = scalar_lea.vmem %s60_s17, 2048  ;;  %p1264_p0 = scmp.lt.s32.totalorder %s60_s17, %s60_s17 }
  0x3c   :  { %p1260_p13 = scmp.ne.s32.totalorder %s60_s17, %s1259_s1  ;;  %p1265_p1 = scmp.lt.s32.totalorder %s1259_s1, %s1259_s1 }
  0x3e   :  { %p1266_p2 = por %p1265_p1, %p1264_p0 }
  0x40   :  { %p1267_p3 = pnand %p1266_p2, %p1260_p13 }
  0x42   :  { %1270 = shalt.err (!%p1267_p3)
}
  0x43   :  { %65 = dma.hbm_to_vmem [thread:$0]  %s1462_s5, 2048, %s60_s17, [#allocation9], %s1302_s11, %s1302_s11, %s1303_s12  }
  0x44   :  { %1293 = dma.done.wait [#allocation3], 256  }
  0x45   :  { %1294 = vsyncadd [#allocation3], 4294967040 }
  0x46   :  { %1295 = dma.done.wait [#allocation6], 18432  }
  0x47   :  { %1296 = vsyncadd [#allocation6], 4294948864 }
  0x48   :  { %1297 = dma.done.wait [#allocation9], 2048  }
  0x49   :  { %1298 = vsyncadd [#allocation9], 4294965248  ;;  %v98_v0 = vld [vmem:[#allocation5 + $0x80] sm:$0xff]  ;;  %v99_v1 = vld [vmem:[#allocation5 + $0x88] sm:$0xff]  ;;  %v1307_v47 = vmov 1983009808   ;;  %v223_v49 = vlaneseq }
  0x4a   :  { %v82_v2 = vld [vmem:[#allocation5] sm:$0xff]  ;;  %v994_v3 = vpack.c.bf16 %v99_v1, %v98_v0  ;;  %v83_v4 = vld [vmem:[#allocation5 + $0x8] sm:$0xff]  ;;  %v100_v11 = vld [vmem:[#allocation5 + $0x90] sm:$0xff]  ;;  %v221_v48 = vunpack.c.l.s4 %v1307_v47  ;;  %vm1309_vm0 = vmmov 0   ;;  %s1311_s28 = smov [#allocation10]  }
  0x4b   :  { %v130_v5 = vld [vmem:[#allocation5 + $0x180] sm:$0xff]  ;;  %v131_v6 = vld [vmem:[#allocation5 + $0x188] sm:$0xff]  ;;  %v996_v7 = vpack.c.bf16 %v83_v4, %v82_v2  ;;  %v101_v13 = vld [vmem:[#allocation5 + $0x98] sm:$0xff]  ;;  %v224_v0 = vshrl.u32 %v223_v49, 7  ;;  %s736_s29 = sshll.u32 %s1311_s28, 4  ;;  %s737_s29 = int_to_ptr.vmem [resolvable:$true] %s736_s29 }
  0x4c   :  { %v1026_v8 = vpack.c.bf16 %v131_v6, %v130_v5  ;;  %v114_v9 = vld [vmem:[#allocation5 + $0x100] sm:$0xff]  ;;  %v115_v10 = vld [vmem:[#allocation5 + $0x108] sm:$0xff]  ;;  %995 = vmatprep.subr.bf16.mxu0 %v994_v3  ;;  %v84_v14 = vld [vmem:[#allocation5 + $0x10] sm:$0xff]  ;;  %v998_v16 = vpack.c.bf16 %v101_v13, %v100_v11  ;;  %v222_v63 = vunpack.c.0.s8 %v221_v48  ;;  %s1271_s30 = scalar_lea.vmem %s737_s29, 32  ;;  %p1276_p5 = scmp.lt.s32.totalorder %s737_s29, %s737_s29 }
  0x4d   :  { %v1028_v12 = vpack.c.bf16 %v115_v10, %v114_v9  ;;  %v85_v15 = vld [vmem:[#allocation5 + $0x18] sm:$0xff]  ;;  %997 = vmatpush3.bf16.msra.mxu0 %v996_v7  ;;  %v132_v18 = vld [vmem:[#allocation5 + $0x190] sm:$0xff]  ;;  %v102_v23 = vld [vmem:[#allocation5 + $0xa0] sm:$0xff]  ;;  %p1272_p4 = scmp.ne.s32.totalorder %s737_s29, %s1271_s30  ;;  %p1277_p6 = scmp.lt.s32.totalorder %s1271_s30, %s1271_s30 }
  0x4e   :  { %1027 = vmatprep.subr.bf16.mxu1 %v1026_v8  ;;  %v1000_v17 = vpack.c.bf16 %v85_v15, %v84_v14  ;;  %v133_v19 = vld [vmem:[#allocation5 + $0x198] sm:$0xff]  ;;  %v116_v20 = vld [vmem:[#allocation5 + $0x110] sm:$0xff]  ;;  %v103_v24 = vld [vmem:[#allocation5 + $0xa8] sm:$0xff]  ;;  %999 = vmatprep.subr.bf16.mxu0 %v998_v16  ;;  %v1409_v13 = vsub.s32 %v222_v63, %v224_v0 }
  0x4f   :  { %1029 = vmatpush3.bf16.msra.mxu1 %v1028_v12  ;;  %v1030_v21 = vpack.c.bf16 %v133_v19, %v132_v18  ;;  %v117_v22 = vld [vmem:[#allocation5 + $0x118] sm:$0xff]  ;;  %v1002_v26 = vpack.c.bf16 %v103_v24, %v102_v23  ;;  %v86_v27 = vld [vmem:[#allocation5 + $0x20] sm:$0xff]  ;;  %v87_v28 = vld [vmem:[#allocation5 + $0x28] sm:$0xff]  ;;  %p1278_p7 = por %p1277_p6, %p1276_p5 }
  0x50   :  { %v1032_v25 = vpack.c.bf16 %v117_v22, %v116_v20  ;;  %v134_v29 = vld [vmem:[#allocation5 + $0x1a0] sm:$0xff]  ;;  %v135_v30 = vld [vmem:[#allocation5 + $0x1a8] sm:$0xff]  ;;  %v1004_v33 = vpack.c.bf16 %v87_v28, %v86_v27  ;;  %v104_v35 = vld [vmem:[#allocation5 + $0xb0] sm:$0xff] }
  0x51   :  { %1031 = vmatprep.subr.bf16.mxu1 %v1030_v21  ;;  %v118_v31 = vld [vmem:[#allocation5 + $0x120] sm:$0xff]  ;;  %v119_v32 = vld [vmem:[#allocation5 + $0x128] sm:$0xff]  ;;  %1001 = vmatpush3.bf16.msra.mxu0 %v1000_v17  ;;  %v1034_v34 = vpack.c.bf16 %v135_v30, %v134_v29  ;;  %v105_v36 = vld [vmem:[#allocation5 + $0xb8] sm:$0xff]  ;;  %p1279_p8 = pnand %p1278_p7, %p1272_p4 }
  0x52   :  { %v88_v37 = vld [vmem:[#allocation5 + $0x30] sm:$0xff]  ;;  %1003 = vmatprep.subr.bf16.mxu0 %v1002_v26  ;;  %v1036_v38 = vpack.c.bf16 %v119_v32, %v118_v31  ;;  %v1006_v39 = vpack.c.bf16 %v105_v36, %v104_v35  ;;  %v89_v40 = vld [vmem:[#allocation5 + $0x38] sm:$0xff]  ;;  %v106_v46 = vld [vmem:[#allocation5 + $0xc0] sm:$0xff] }
  0x53   :  { %1033 = vmatpush3.bf16.msra.mxu1 %v1032_v25  ;;  %v136_v41 = vld [vmem:[#allocation5 + $0x1b0] sm:$0xff]  ;;  %v137_v42 = vld [vmem:[#allocation5 + $0x1b8] sm:$0xff]  ;;  %v107_v50 = vld [vmem:[#allocation5 + $0xc8] sm:$0xff]  ;;  %v1008_v51 = vpack.c.bf16 %v89_v40, %v88_v37 }
  0x54   :  { %1035 = vmatprep.subr.bf16.mxu1 %v1034_v34  ;;  %v1038_v43 = vpack.c.bf16 %v137_v42, %v136_v41  ;;  %v120_v44 = vld [vmem:[#allocation5 + $0x130] sm:$0xff]  ;;  %v121_v45 = vld [vmem:[#allocation5 + $0x138] sm:$0xff]  ;;  %v138_v52 = vld [vmem:[#allocation5 + $0x1c0] sm:$0xff]  ;;  %v1010_v55 = vpack.c.bf16 %v107_v50, %v106_v46 }
  0x55   :  { %1005 = vmatpush3.bf16.msra.mxu0 %v1004_v33  ;;  %v139_v53 = vld [vmem:[#allocation5 + $0x1c8] sm:$0xff]  ;;  %v1040_v54 = vpack.c.bf16 %v121_v45, %v120_v44  ;;  %v90_v56 = vld [vmem:[#allocation5 + $0x40] sm:$0xff]  ;;  %v108_v61 = vld [vmem:[#allocation5 + $0xd0] sm:$0xff] }
  0x56   :  { %1007 = vmatprep.subr.bf16.mxu0 %v1006_v39  ;;  %v91_v57 = vld [vmem:[#allocation5 + $0x48] sm:$0xff]  ;;  %v122_v58 = vld [vmem:[#allocation5 + $0x140] sm:$0xff]  ;;  %v1042_v59 = vpack.c.bf16 %v139_v53, %v138_v52  ;;  %v109_v62 = vld [vmem:[#allocation5 + $0xd8] sm:$0xff] }
  0x57   :  { %1037 = vmatpush3.bf16.msra.mxu1 %v1036_v38  ;;  %v123_v60 = vld [vmem:[#allocation5 + $0x148] sm:$0xff]  ;;  %v140_v1 = vld [vmem:[#allocation5 + $0x1d0] sm:$0xff]  ;;  %v141_v2 = vld [vmem:[#allocation5 + $0x1d8] sm:$0xff]  ;;  %v1012_v3 = vpack.c.bf16 %v91_v57, %v90_v56  ;;  %v1014_v5 = vpack.c.bf16 %v109_v62, %v108_v61 }
  0x58   :  { %1039 = vmatprep.subr.bf16.mxu1 %v1038_v43  ;;  %v1044_v4 = vpack.c.bf16 %v123_v60, %v122_v58  ;;  %v92_v6 = vld [vmem:[#allocation5 + $0x50] sm:$0xff]  ;;  %v93_v7 = vld [vmem:[#allocation5 + $0x58] sm:$0xff]  ;;  %v1046_v9 = vpack.c.bf16 %v141_v2, %v140_v1  ;;  %v110_v11 = vld [vmem:[#allocation5 + $0xe0] sm:$0xff] }
  0x59   :  { %1009 = vmatpush3.bf16.msra.mxu0 %v1008_v51  ;;  %v124_v8 = vld [vmem:[#allocation5 + $0x150] sm:$0xff]  ;;  %v125_v10 = vld [vmem:[#allocation5 + $0x158] sm:$0xff]  ;;  %v111_v12 = vld [vmem:[#allocation5 + $0xe8] sm:$0xff]  ;;  %v1016_v16 = vpack.c.bf16 %v93_v7, %v92_v6 }
  0x5a   :  { %1011 = vmatprep.subr.bf16.mxu0 %v1010_v55  ;;  %v142_v14 = vld [vmem:[#allocation5 + $0x1e0] sm:$0xff]  ;;  %v143_v15 = vld [vmem:[#allocation5 + $0x1e8] sm:$0xff]  ;;  %v1048_v18 = vpack.c.bf16 %v125_v10, %v124_v8  ;;  %v1018_v19 = vpack.c.bf16 %v111_v12, %v110_v11  ;;  %v80_v22 = vld [vmem:[#allocation2] sm:$0xff] }
  0x5b   :  { %1041 = vmatpush3.bf16.msra.mxu1 %v1040_v54  ;;  %v94_v17 = vld [vmem:[#allocation5 + $0x60] sm:$0xff]  ;;  %v95_v20 = vld [vmem:[#allocation5 + $0x68] sm:$0xff]  ;;  %v1050_v23 = vpack.c.bf16 %v143_v15, %v142_v14  ;;  %v112_v25 = vld [vmem:[#allocation5 + $0xf0] sm:$0xff]  ;;  %v226_v27 = vrot.slane %v80_v22, %v1409_v13  ;;  %v219_v28 = vcombine.high %v80_v22, %v80_v22 }
  0x5c   :  { %1043 = vmatprep.subr.bf16.mxu1 %v1042_v59  ;;  %v126_v21 = vld [vmem:[#allocation5 + $0x160] sm:$0xff]  ;;  %v127_v24 = vld [vmem:[#allocation5 + $0x168] sm:$0xff]  ;;  %v113_v26 = vld [vmem:[#allocation5 + $0xf8] sm:$0xff]  ;;  %v1020_v31 = vpack.c.bf16 %v95_v20, %v94_v17 }
  0x5d   :  { %1013 = vmatpush3.bf16.msra.mxu0 %v1012_v3  ;;  %v144_v29 = vld [vmem:[#allocation5 + $0x1f0] sm:$0xff]  ;;  %v145_v30 = vld [vmem:[#allocation5 + $0x1f8] sm:$0xff]  ;;  %v234_v32 = vcombine.high %v226_v27, %v226_v27  ;;  %v233_v33 = vrot.slane %v219_v28, %v1409_v13  ;;  %v1052_v34 = vpack.c.bf16 %v127_v24, %v126_v21  ;;  %v1022_v35 = vpack.c.bf16 %v113_v26, %v112_v25  ;;  %v162_v41 = vld [vmem:[#allocation5 + $0x280] sm:$0xff] }
  0x5e   :  { %1015 = vmatprep.subr.bf16.mxu0 %v1014_v5  ;;  %v96_v36 = vld [vmem:[#allocation5 + $0x70] sm:$0xff]  ;;  %v97_v37 = vld [vmem:[#allocation5 + $0x78] sm:$0xff]  ;;  %v1054_v39 = vpack.c.bf16 %v145_v30, %v144_v29  ;;  %v163_v42 = vld [vmem:[#allocation5 + $0x288] sm:$0xff] }
  0x5f   :  { %1045 = vmatpush3.bf16.msra.mxu1 %v1044_v4  ;;  %v128_v38 = vld [vmem:[#allocation5 + $0x170] sm:$0xff]  ;;  %v129_v40 = vld [vmem:[#allocation5 + $0x178] sm:$0xff]  ;;  %325 = vmatprep.mubr.f32.mxu0 %v234_v32  ;;  %v235_v43 = vcombine.high %v233_v33, %v233_v33  ;;  %v194_v44 = vld [vmem:[#allocation5 + $0x380] sm:$0xff]  ;;  %v1024_v46 = vpack.c.bf16 %v97_v37, %v96_v36  ;;  %v1058_v48 = vpack.c.bf16 %v163_v42, %v162_v41 }
  0x60   :  { %1047 = vmatprep.subr.bf16.mxu1 %v1046_v9  ;;  %v195_v45 = vld [vmem:[#allocation5 + $0x388] sm:$0xff]  ;;  %v1056_v47 = vpack.c.bf16 %v129_v40, %v128_v38  ;;  %v146_v49 = vld [vmem:[#allocation5 + $0x200] sm:$0xff]  ;;  %v164_v54 = vld [vmem:[#allocation5 + $0x290] sm:$0xff] }
  0x61   :  { %1017 = vmatpush3.bf16.msra.mxu0 %v1016_v16  ;;  %395 = vmatprep.mubr.f32.mxu1 %v235_v43  ;;  %v147_v50 = vld [vmem:[#allocation5 + $0x208] sm:$0xff]  ;;  %v178_v51 = vld [vmem:[#allocation5 + $0x300] sm:$0xff]  ;;  %v1090_v52 = vpack.c.bf16 %v195_v45, %v194_v44  ;;  %v165_v55 = vld [vmem:[#allocation5 + $0x298] sm:$0xff] }
  0x62   :  { %1019 = vmatprep.subr.bf16.mxu0 %v1018_v19  ;;  %v179_v53 = vld [vmem:[#allocation5 + $0x308] sm:$0xff]  ;;  %v196_v56 = vld [vmem:[#allocation5 + $0x390] sm:$0xff]  ;;  %v197_v57 = vld [vmem:[#allocation5 + $0x398] sm:$0xff]  ;;  %v1060_v58 = vpack.c.bf16 %v147_v50, %v146_v49  ;;  %v1062_v60 = vpack.c.bf16 %v165_v55, %v164_v54 }
  0x63   :  { %1049 = vmatpush3.bf16.msra.mxu1 %v1048_v18  ;;  %v1092_v59 = vpack.c.bf16 %v179_v53, %v178_v51  ;;  %v148_v61 = vld [vmem:[#allocation5 + $0x210] sm:$0xff]  ;;  %v149_v62 = vld [vmem:[#allocation5 + $0x218] sm:$0xff]  ;;  %v1094_v0 = vpack.c.bf16 %v197_v57, %v196_v56  ;;  %v166_v2 = vld [vmem:[#allocation5 + $0x2a0] sm:$0xff] }
  0x64   :  { %1051 = vmatprep.subr.bf16.mxu1 %v1050_v23  ;;  %v180_v63 = vld [vmem:[#allocation5 + $0x310] sm:$0xff]  ;;  %v181_v1 = vld [vmem:[#allocation5 + $0x318] sm:$0xff]  ;;  %v167_v3 = vld [vmem:[#allocation5 + $0x2a8] sm:$0xff]  ;;  %v1064_v6 = vpack.c.bf16 %v149_v62, %v148_v61 }
  0x65   :  { %1021 = vmatpush3.bf16.msra.mxu0 %v1020_v31  ;;  %v198_v4 = vld [vmem:[#allocation5 + $0x3a0] sm:$0xff]  ;;  %v199_v5 = vld [vmem:[#allocation5 + $0x3a8] sm:$0xff]  ;;  %v1096_v7 = vpack.c.bf16 %v181_v1, %v180_v63  ;;  %v1066_v8 = vpack.c.bf16 %v167_v3, %v166_v2  ;;  %v168_v15 = vld [vmem:[#allocation5 + $0x2b0] sm:$0xff] }
  0x66   :  { %1023 = vmatprep.subr.bf16.mxu0 %v1022_v35  ;;  %v150_v9 = vld [vmem:[#allocation5 + $0x220] sm:$0xff]  ;;  %v151_v10 = vld [vmem:[#allocation5 + $0x228] sm:$0xff]  ;;  %v1098_v12 = vpack.c.bf16 %v199_v5, %v198_v4  ;;  %v169_v16 = vld [vmem:[#allocation5 + $0x2b8] sm:$0xff] }
  0x67   :  { %1053 = vmatpush3.bf16.msra.mxu1 %v1052_v34  ;;  %v182_v11 = vld [vmem:[#allocation5 + $0x320] sm:$0xff]  ;;  %v183_v14 = vld [vmem:[#allocation5 + $0x328] sm:$0xff]  ;;  %v200_v17 = vld [vmem:[#allocation5 + $0x3b0] sm:$0xff]  ;;  %v1068_v19 = vpack.c.bf16 %v151_v10, %v150_v9  ;;  %v1070_v21 = vpack.c.bf16 %v169_v16, %v168_v15 }
  0x68   :  { %1055 = vmatprep.subr.bf16.mxu1 %v1054_v39  ;;  %v201_v18 = vld [vmem:[#allocation5 + $0x3b8] sm:$0xff]  ;;  %v1100_v20 = vpack.c.bf16 %v183_v14, %v182_v11  ;;  %v152_v22 = vld [vmem:[#allocation5 + $0x230] sm:$0xff]  ;;  %v171_v28 = vld [vmem:[#allocation5 + $0x2c8] sm:$0xff] }
  0x69   :  { %1025 = vmatpush3.bf16.msra.mxu0 %v1024_v46  ;;  %v153_v23 = vld [vmem:[#allocation5 + $0x238] sm:$0xff]  ;;  %v184_v24 = vld [vmem:[#allocation5 + $0x330] sm:$0xff]  ;;  %v1102_v25 = vpack.c.bf16 %v201_v18, %v200_v17  ;;  %v202_v29 = vld [vmem:[#allocation5 + $0x3c0] sm:$0xff] }
  0x6a   :  { %1059 = vmatprep.subr.bf16.mxu0 %v1058_v48  ;;  %v185_v26 = vld [vmem:[#allocation5 + $0x338] sm:$0xff]  ;;  %v203_v30 = vld [vmem:[#allocation5 + $0x3c8] sm:$0xff]  ;;  %v1072_v32 = vpack.c.bf16 %v153_v23, %v152_v22  ;;  %v154_v37 = vld [vmem:[#allocation5 + $0x240] sm:$0xff]  ;;  %v1308_v22 = vmov 0.0|0.0  }
  0x6b   :  { %1057 = vmatpush3.bf16.msra.mxu1 %v1056_v47  ;;  %v81_v31 = vld [vmem:[#allocation2 + $0x8] sm:$0xff]  ;;  %v1104_v35 = vpack.c.bf16 %v185_v26, %v184_v24  ;;  %v155_v38 = vld [vmem:[#allocation5 + $0x248] sm:$0xff]  ;;  %v186_v39 = vld [vmem:[#allocation5 + $0x340] sm:$0xff]  ;;  %v1106_v40 = vpack.c.bf16 %v203_v30, %v202_v29 }
  0x6c   :  { %1091 = vmatprep.subr.bf16.mxu1 %v1090_v52  ;;  %326 = vmatmul.mubr.f32.vlgmr.msra.gmra.mrb[0].mxu0 %v226_v27  ;;  %v170_v27 = vld [vmem:[#allocation5 + $0x2c0] sm:$0xff]  ;;  %v236_v34 = vcombine.high %v81_v31, %v81_v31  ;;  %v187_v41 = vld [vmem:[#allocation5 + $0x348] sm:$0xff]  ;;  %v172_v42 = vld [vmem:[#allocation5 + $0x2d0] sm:$0xff]  ;;  %v1076_v48 = vpack.c.bf16 %v155_v38, %v154_v37 }
  0x6d   :  { %1061 = vmatpush3.bf16.msra.mxu0 %v1060_v58  ;;  %v1074_v36 = vpack.c.bf16 %v171_v28, %v170_v27  ;;  %v173_v43 = vld [vmem:[#allocation5 + $0x2d8] sm:$0xff]  ;;  %v204_v46 = vld [vmem:[#allocation5 + $0x3d0] sm:$0xff]  ;;  %v1108_v50 = vpack.c.bf16 %v187_v41, %v186_v39  ;;  %v174_v57 = vld [vmem:[#allocation5 + $0x2e0] sm:$0xff] }
  0x6e   :  { %396 = vmatmul.mubr.f32.vlgmr.msra.gmra.mrb[0].mxu1 %v233_v33  ;;  %1063 = vmatprep.subr.bf16.mxu0 %v1062_v60  ;;  %v1414_v33 = vrot.slane %v81_v31, %v1409_v13  ;;  %v250_v45 = vrot.slane %v236_v34, %v1409_v13  ;;  %v205_v47 = vld [vmem:[#allocation5 + $0x3d8] sm:$0xff]  ;;  %v1078_v51 = vpack.c.bf16 %v173_v43, %v172_v42  ;;  %v156_v52 = vld [vmem:[#allocation5 + $0x250] sm:$0xff]  ;;  %v175_v58 = vld [vmem:[#allocation5 + $0x2e8] sm:$0xff] }
  0x6f   :  { %1093 = vmatpush3.bf16.msra.mxu1 %v1092_v59  ;;  %v157_v53 = vld [vmem:[#allocation5 + $0x258] sm:$0xff]  ;;  %v188_v54 = vld [vmem:[#allocation5 + $0x350] sm:$0xff]  ;;  %v1110_v55 = vpack.c.bf16 %v205_v47, %v204_v46  ;;  %v206_v13 = vld [vmem:[#allocation5 + $0x3e0] sm:$0xff]  ;;  %v1082_v62 = vpack.c.bf16 %v175_v58, %v174_v57 }
  0x70   :  { %1095 = vmatprep.subr.bf16.mxu1 %v1094_v0  ;;  %v251_v44 = vcombine.high %v1414_v33, %v1414_v33  ;;  %v252_v49 = vcombine.high %v250_v45, %v250_v45  ;;  %v189_v56 = vld [vmem:[#allocation5 + $0x358] sm:$0xff]  ;;  %v207_v59 = vld [vmem:[#allocation5 + $0x3e8] sm:$0xff]  ;;  %v1080_v60 = vpack.c.bf16 %v157_v53, %v156_v52  ;;  %v158_v63 = vld [vmem:[#allocation5 + $0x260] sm:$0xff] }
  0x71   :  { %1065 = vmatpush3.bf16.msra.mxu0 %v1064_v6  ;;  %v1112_v61 = vpack.c.bf16 %v189_v56, %v188_v54  ;;  %v159_v0 = vld [vmem:[#allocation5 + $0x268] sm:$0xff]  ;;  %v190_v1 = vld [vmem:[#allocation5 + $0x360] sm:$0xff]  ;;  %v1114_v2 = vpack.c.bf16 %v207_v59, %v206_v13  ;;  %v176_v4 = vld [vmem:[#allocation5 + $0x2f0] sm:$0xff] }
  0x72   :  { %1067 = vmatprep.subr.bf16.mxu0 %v1066_v8  ;;  %465 = vmatprep.mubr.f32.mxu0 %v251_v44  ;;  %v191_v3 = vld [vmem:[#allocation5 + $0x368] sm:$0xff]  ;;  %v177_v5 = vld [vmem:[#allocation5 + $0x2f8] sm:$0xff]  ;;  %v208_v6 = vld [vmem:[#allocation5 + $0x3f0] sm:$0xff]  ;;  %v1084_v8 = vpack.c.bf16 %v159_v0, %v158_v63  ;;  %v1310_v44 = vmov 0.0  }
  0x73   :  { %1097 = vmatpush3.bf16.msra.mxu1 %v1096_v7  ;;  %535 = vmatprep.mubr.f32.mxu1 %v252_v49  ;;  %v209_v7 = vld [vmem:[#allocation5 + $0x3f8] sm:$0xff]  ;;  %v1116_v9 = vpack.c.bf16 %v191_v3, %v190_v1  ;;  %v1086_v10 = vpack.c.bf16 %v177_v5, %v176_v4  ;;  %v160_v11 = vld [vmem:[#allocation5 + $0x270] sm:$0xff]  ;;  %v546_v26 = vld [vmem:[#allocation7 + $0x20] sm:$0xff] }
  0x74   :  { %1099 = vmatprep.subr.bf16.mxu1 %v1098_v12  ;;  %v161_v12 = vld [vmem:[#allocation5 + $0x278] sm:$0xff]  ;;  %v1118_v14 = vpack.c.bf16 %v209_v7, %v208_v6  ;;  %v192_v15 = vld [vmem:[#allocation5 + $0x370] sm:$0xff]  ;;  %v547_v27 = vld [vmem:[#allocation7 + $0x28] sm:$0xff] }
  0x75   :  { %1069 = vmatpush3.bf16.msra.mxu0 %v1068_v19  ;;  %v193_v16 = vld [vmem:[#allocation5 + $0x378] sm:$0xff]  ;;  %v1088_v17 = vpack.c.bf16 %v161_v12, %v160_v11  ;;  %v542_v19 = vld [vmem:[#allocation7] sm:$0xff]  ;;  %v1129_v28 = vpack.c.bf16 %v547_v27, %v546_v26  ;;  %v548_v29 = vld [vmem:[#allocation7 + $0x30] sm:$0xff] }
  0x76   :  { %1071 = vmatprep.subr.bf16.mxu0 %v1070_v21  ;;  %v1120_v18 = vpack.c.bf16 %v193_v16, %v192_v15  ;;  %v544_v21 = vld [vmem:[#allocation7 + $0x10] sm:$0xff]  ;;  %v545_v24 = vld [vmem:[#allocation7 + $0x18] sm:$0xff]  ;;  %v554_v38 = vld [vmem:[#allocation7 + $0x60] sm:$0xff] }
  0x77   :  { %1101 = vmatpush3.bf16.msra.mxu1 %v1100_v20  ;;  %v543_v20 = vld [vmem:[#allocation7 + $0x8] sm:$0xff]  ;;  %v549_v30 = vld [vmem:[#allocation7 + $0x38] sm:$0xff]  ;;  %v556_v41 = vld [vmem:[#allocation7 + $0x70] sm:$0xff] }
  0x78   :  { %1103 = vmatprep.subr.bf16.mxu1 %v1102_v25  ;;  %v1123_v23 = vpack.c.bf16 %v543_v20, %v542_v19  ;;  %v1126_v25 = vpack.c.bf16 %v545_v24, %v544_v21  ;;  %v1132_v31 = vpack.c.bf16 %v549_v30, %v548_v29  ;;  %v555_v39 = vld [vmem:[#allocation7 + $0x68] sm:$0xff]  ;;  %v557_v42 = vld [vmem:[#allocation7 + $0x78] sm:$0xff]  ;;  %v638_v47 = vld [vmem:[#allocation8 + $0x10] sm:$0xff] }
  0x79   :  { %1073 = vmatpush3.bf16.msra.mxu0 %v1072_v32  ;;  %v550_v32 = vld [vmem:[#allocation7 + $0x40] sm:$0xff]  ;;  %v1144_v43 = vpack.c.bf16 %v557_v42, %v556_v41  ;;  %v637_v46 = vld [vmem:[#allocation8 + $0x8] sm:$0xff]  ;;  %v639_v49 = vld [vmem:[#allocation8 + $0x18] sm:$0xff] }
  0x7a   :  { %1075 = vmatprep.subr.bf16.mxu0 %v1074_v36  ;;  %v553_v36 = vld [vmem:[#allocation7 + $0x58] sm:$0xff]  ;;  %v641_v52 = vld [vmem:[#allocation8 + $0x28] sm:$0xff]  ;;  %v642_v54 = vld [vmem:[#allocation8 + $0x30] sm:$0xff] }
  0x7b   :  { %1105 = vmatpush3.bf16.msra.mxu1 %v1104_v35  ;;  %v552_v35 = vld [vmem:[#allocation7 + $0x50] sm:$0xff]  ;;  %v644_v57 = vld [vmem:[#allocation8 + $0x40] sm:$0xff]  ;;  %v645_v58 = vld [vmem:[#allocation8 + $0x48] sm:$0xff] }
  0x7c   :  { %1107 = vmatprep.subr.bf16.mxu1 %v1106_v40  ;;  %v1138_v37 = vpack.c.bf16 %v553_v36, %v552_v35  ;;  %v1141_v40 = vpack.c.bf16 %v555_v39, %v554_v38  ;;  %v1159_v13 = vpack.c.bf16 %v645_v58, %v644_v57  ;;  %v646_v59 = vld [vmem:[#allocation8 + $0x50] sm:$0xff]  ;;  %v649_v63 = vld [vmem:[#allocation8 + $0x68] sm:$0xff]  ;;  %v651_v21 = vld [vmem:[#allocation8 + $0x78] sm:$0xff] }
  0x7d   :  { %1077 = vmatpush3.bf16.msra.mxu0 %v1076_v48  ;;  %v650_v20 = vld [vmem:[#allocation8 + $0x70] sm:$0xff] }
  0x7e   :  { %1079 = vmatprep.subr.bf16.mxu0 %v1078_v51  ;;  %v640_v51 = vld [vmem:[#allocation8 + $0x20] sm:$0xff] }
  0x7f   :  { %1109 = vmatpush3.bf16.msra.mxu1 %v1108_v50  ;;  %v1150_v50 = vpack.c.bf16 %v639_v49, %v638_v47  ;;  %v1153_v53 = vpack.c.bf16 %v641_v52, %v640_v51 }
  0x80   :  { %1111 = vmatprep.subr.bf16.mxu1 %v1110_v55  ;;  %v643_v55 = vld [vmem:[#allocation8 + $0x38] sm:$0xff] }
  0x81   :  { %1081 = vmatpush3.bf16.msra.mxu0 %v1080_v60  ;;  %v1156_v56 = vpack.c.bf16 %v643_v55, %v642_v54  ;;  %v647_v60 = vld [vmem:[#allocation8 + $0x58] sm:$0xff] }
  0x82   :  { %1083 = vmatprep.subr.bf16.mxu0 %v1082_v62  ;;  %v648_v62 = vld [vmem:[#allocation8 + $0x60] sm:$0xff] }
  0x83   :  { %1113 = vmatpush3.bf16.msra.mxu1 %v1112_v61  ;;  %v1162_v61 = vpack.c.bf16 %v647_v60, %v646_v59  ;;  %v1165_v0 = vpack.c.bf16 %v649_v63, %v648_v62 }
  0x84   :  { %1115 = vmatprep.subr.bf16.mxu1 %v1114_v2  ;;  %v747_v2 = vld [vmem:[%s1459_s2] ss:$0 sm:$0xff] }
  0x85   :  { %1085 = vmatpush3.bf16.msra.mxu0 %v1084_v8 }
  0x86   :  { %1087 = vmatprep.subr.bf16.mxu0 %v1086_v10 }
  0x87   :  { %1117 = vmatpush3.bf16.msra.mxu1 %v1116_v9 }
  0x88   :  { %1119 = vmatprep.subr.bf16.mxu1 %v1118_v14 }
  0x89   :  { %1089 = vmatpush3.bf16.msra.mxu0 %v1088_v17 }
  0x8a   :  { %1122 = vmatprep.subr.bf16.mxu0 %v1308_v22 }
  0x8b   :  { %1121 = vmatpush3.bf16.msra.mxu1 %v1120_v18 }
  0x8c   :  { %466 = vmatmul.mubr.f32.vlgmr.msra.gmra.mrb[2].mxu0 %v1414_v33  ;;  %1146 = vmatprep.subr.bf16.mxu1 %v1308_v22  ;;  %v551_v33 = vld [vmem:[#allocation7 + $0x48] sm:$0xff] }
  0x8d   :  { %1124 = vmatpush3.bf16.msra.mxu0 %v1123_v23  ;;  %v1135_v34 = vpack.c.bf16 %v551_v33, %v550_v32  ;;  %956 = vmatprep.mubr.msk.f32.mxu0 %vm1309_vm0, %v1310_v44  ;;  %v748_v23 = vld [vmem:[%s1461_s4] ss:$0 sm:$0xff] }
  0x8e   :  { %536 = vmatmul.mubr.f32.vlgmr.msra.gmra.mrb[2].mxu1 %v250_v45  ;;  %1125 = vmatprep.subr.bf16.mxu0 %v1308_v22  ;;  %v636_v45 = vld [vmem:[#allocation8] sm:$0xff] }
  0x8f   :  { %991 = vmatprep.mubr.msk.f32.mxu1 %vm1309_vm0, %v1310_v44  ;;  %v1147_v48 = vpack.c.bf16 %v637_v46, %v636_v45 }
  0x91   :  { %1127 = vmatpush3.bf16.msra.mxu0 %v1126_v25  ;;  %1148 = vmatpush3.bf16.msra.mxu1 %v1147_v48 }
  0x92   :  { %1128 = vmatprep.subr.bf16.mxu0 %v1308_v22  ;;  %1149 = vmatprep.subr.bf16.mxu1 %v1308_v22 }
  0x95   :  { %1130 = vmatpush3.bf16.msra.mxu0 %v1129_v28  ;;  %1151 = vmatpush3.bf16.msra.mxu1 %v1150_v50  ;;  %v749_v28 = vld [vmem:[%s1463_s6] ss:$0 sm:$0xff] }
  0x96   :  { %1131 = vmatprep.subr.bf16.mxu0 %v1308_v22  ;;  %1152 = vmatprep.subr.bf16.mxu1 %v1308_v22 }
  0x99   :  { %1133 = vmatpush3.bf16.msra.mxu0 %v1132_v31  ;;  %1154 = vmatpush3.bf16.msra.mxu1 %v1153_v53 }
  0x9a   :  { %1134 = vmatprep.subr.bf16.mxu0 %v1308_v22  ;;  %1155 = vmatprep.subr.bf16.mxu1 %v1308_v22 }
  0x9d   :  { %1136 = vmatpush3.bf16.msra.mxu0 %v1135_v34  ;;  %1157 = vmatpush3.bf16.msra.mxu1 %v1156_v56 }
  0x9e   :  { %1137 = vmatprep.subr.bf16.mxu0 %v1308_v22  ;;  %1158 = vmatprep.subr.bf16.mxu1 %v1308_v22 }
  0xa1   :  { %1139 = vmatpush3.bf16.msra.mxu0 %v1138_v37  ;;  %1160 = vmatpush3.bf16.msra.mxu1 %v1159_v13 }
  0xa2   :  { %1140 = vmatprep.subr.bf16.mxu0 %v1308_v22  ;;  %1161 = vmatprep.subr.bf16.mxu1 %v1308_v22 }
  0xa5   :  { %1142 = vmatpush3.bf16.msra.mxu0 %v1141_v40  ;;  %1163 = vmatpush3.bf16.msra.mxu1 %v1162_v61 }
  0xa6   :  { %1143 = vmatprep.subr.bf16.mxu0 %v1308_v22  ;;  %1164 = vmatprep.subr.bf16.mxu1 %v1308_v22 }
  0xa9   :  { %1145 = vmatpush3.bf16.msra.mxu0 %v1144_v43  ;;  %1166 = vmatpush3.bf16.msra.mxu1 %v1165_v0 }
  0xaa   :  { %1167 = vmatprep.subr.bf16.mxu1 %v1308_v22  ;;  %v1168_v22 = vpack.c.bf16 %v651_v21, %v650_v20 }
  0xad   :  { %1169 = vmatpush3.bf16.msra.mxu1 %v1168_v22 }
 0x13f   :  { %v782_v1 = vpop.f32.mrb[0].mxu0 }
 0x140   :  { %v783_v3 = vpop.f32.mrb[1].mxu0 }
 0x141   :  { %v817_v4 = vpop.f32.mrb[0].mxu1  ;;  %v784_v5 = vadd.f32 %v783_v3, %v782_v1 }
 0x142   :  { %v818_v6 = vpop.f32.mrb[1].mxu1 }
 0x143   :  { %v819_v7 = vadd.f32 %v818_v6, %v817_v4  ;;  %v328_v8 = vadd.f32 %v784_v5, %v747_v2 }
 0x145   :  { %v398_v9 = vadd.f32 %v819_v7, %v328_v8 }
 0x15f   :  { %v852_v10 = vpop.f32.mrb[2].mxu0 }
 0x160   :  { %v853_v11 = vpop.f32.mrb[3].mxu0 }
 0x161   :  { %v887_v12 = vpop.f32.mrb[2].mxu1  ;;  %v854_v14 = vadd.f32 %v853_v11, %v852_v10 }
 0x162   :  { %v888_v15 = vpop.f32.mrb[3].mxu1 }
 0x163   :  { %v889_v16 = vadd.f32 %v888_v15, %v887_v12  ;;  %v468_v17 = vadd.f32 %v854_v14, %v398_v9 }
 0x165   :  { %v538_v18 = vadd.f32 %v889_v16, %v468_v17 }
 0x167   :  { %v541_v19 = vmax.f32 %v538_v18, 0.0 }
 0x169   :  { %957 = vmatmul.mubr.f32.vlgmr.msra.gmra.mrb[4].mxu0 %v541_v19 }
 0x23c   :  { %v631_v24 = vpop.f32.mrb[4].mxu0 }
 0x23d   :  { %v632_v25 = vadd.f32 %v748_v23, %v631_v24  ;;  %v958_v26 = vpop.f32.mrb[5].mxu0 }
 0x23f   :  { %v635_v27 = vmax.f32 %v632_v25, 0.0 }
 0x241   :  { %992 = vmatmul.mubr.f32.vlgmr.msra.gmra.mrb[4].mxu1 %v635_v27 }
 0x314   :  { %v725_v29 = vpop.f32.mrb[4].mxu1 }
 0x315   :  { %v726_v30 = vadd.f32 %v749_v28, %v725_v29  ;;  %v993_v31 = vpop.f32.mrb[5].mxu1 }
 0x317   :  { %729 = vst [vmem:[#allocation10] sm:$0x3] %v726_v30 }
 0x318   :  { %1282 = shalt.err (!%p1279_p8)
}
 0x319   :  { %s1283_s9 = scalar_lea.hbm %s1464_s7, 32 }
 0x31a   :  { %p1284_p9 = scmp.ne.s32.totalorder %s1464_s7, %s1283_s9  ;;  %p1287_p10 = scmp.lt.u32.totalorder %s1283_s9, %s1464_s7 }
 0x31c   :  { %p1289_p11 = pnand %p1287_p10, %p1284_p9 }
 0x31e   :  { %1292 = shalt.err (!%p1289_p11)
}
 0x31f   :  { %739 = dma.vmem_to_hbm [thread:$0]  %s737_s29, 32, %s1464_s7, [#allocation4]  }
 0x320   :  { %1299 = dma.done.wait [#allocation4], 32  }
 0x321   :  { %1300 = vsyncadd [#allocation4], 4294967264 }
 0x322   :  { %743 = vsyncpa [#allocation3], 1 }
 0x323   :  { %744 = vsyncpa [#allocation6], 1 }
 0x324   :  { %745 = vsyncpa [#allocation9], 1 }
 0x325   :  { %746 = vsyncpa [#allocation4], 1 }

</bundles_post_ra>
